<compile_context>
chip_gen: v6e
topology: v6e:2x2x1
jax: 0.10.0
libtpu: 0.0.40
codegen_flags: <defaults>
</compile_context>

<pallas_src>
import functools

import jax
import jax.numpy as jnp
from jax.experimental import pallas as pl
from jax.experimental.pallas import tpu as pltpu


def _round_up(x, m):
    return ((x + m - 1) // m) * m


def _flash_sdpa_kernel(q_ref, k_ref, v_ref, mk_ref, mq_ref, o_ref,
                       m_sc, l_sc, acc_sc, *, inv_temperature):
    # q_ref: (1, bq, D)   k_ref: (1, bk, D)   v_ref: (1, bk, Dv)
    # mk_ref: (1, 1, bk)  mq_ref: (1, bq, 1)  o_ref: (1, bq, Dv)
    # scratch: m_sc/l_sc (bq, 1) f32, acc_sc (bq, Dv) f32
    ki = pl.program_id(2)

    @pl.when(ki == 0)
    def _():
        m_sc[...] = jnp.full_like(m_sc, -jnp.inf)
        l_sc[...] = jnp.zeros_like(l_sc)
        acc_sc[...] = jnp.zeros_like(acc_sc)

    # Scale q with a multiply in its native dtype (1/temperature folded at trace time).
    q = q_ref[0] * jnp.asarray(inv_temperature, q_ref.dtype)        # (bq, D)
    k = k_ref[0]                                                    # (bk, D)
    v = v_ref[0]                                                    # (bk, Dv)

    # Scores: contract head dims (no transpose op), f32 accumulation on the MXU.
    s = jax.lax.dot_general(q, k, (((1,), (1,)), ((), ())),
                            preferred_element_type=jnp.float32)     # (bq, bk)

    # Additive key-mask bias: 0 where keep, -1e9 where masked (incl. Lk padding).
    bias = (mk_ref[0] - 1.0) * 1e9                                  # (1, bk)
    s = s + bias

    # Online softmax with deferred normalization (unnormalized probs <= 1).
    m_prev = m_sc[...]                                              # (bq, 1)
    m_new = jnp.maximum(m_prev, jnp.max(s, axis=-1, keepdims=True))
    alpha = jnp.exp(m_prev - m_new)
    p = jnp.exp(s - m_new)                                          # (bq, bk) f32

    l_sc[...] = alpha * l_sc[...] + jnp.sum(p, axis=-1, keepdims=True)
    acc_sc[...] = alpha * acc_sc[...] + jnp.dot(
        p.astype(v.dtype), v, preferred_element_type=jnp.float32)   # (bq, Dv)
    m_sc[...] = m_new

    # TODO(synk): nn.Dropout(attn_dropout=0.1) is identity in eval mode;
    # training-mode stochastic masking (pltpu.prng_*) intentionally not emitted.

    @pl.when(ki == pl.num_programs(2) - 1)
    def _():
        # Normalize once on the small (bq, Dv) tile; EUP reciprocal.
        out = acc_sc[...] * pl.reciprocal(l_sc[...], approx=True)
        # Query-position mask (also zeroes padded query rows).
        o_ref[0] = (out * mq_ref[0]).astype(o_ref.dtype)


def scaled_dot_product_attention(q, k, v, mask, *, temperature,
                                 block_q=None, block_k=None):
    """q, k: (B,H,L,Dk), v: (B,H,L,Dv), mask: broadcastable to (B,H,L) (nonzero = keep)."""
    B, H, Lq, D = q.shape
    Lk, Dv = k.shape[2], v.shape[3]
    assert k.shape == (B, H, Lk, D) and v.shape == (B, H, Lk, Dv)
    # The module applies the SAME mask to key positions and query positions.
    assert Lq == Lk, "module semantics require Lq == Lk (one mask for both)"
    BH = B * H

    # Per-generation default tile sizes: 256 for the 2x256x256 MXU (v6e/v7x),
    # 128 for v5e's 4x128x128 MXU and smaller scoped-VMEM default.
    try:
        kind = jax.devices()[0].device_kind.lower()
    except Exception:
        kind = ""
    default_blk = 128 if "v5" in kind else 256
    bq = int(block_q or default_blk)
    bk = _round_up(int(block_k or default_blk), 128)

    # Clamp for short sequences (tiles stay multiples of 8 sublanes).
    bq = min(bq, _round_up(Lq, 8))
    Lqp = _round_up(Lq, bq)
    if Lk <= bk:
        bk = _round_up(Lk, 8)         # single key tile == full (padded) Lk
        Lkp = bk
    else:
        Lkp = _round_up(Lk, bk)       # bk is a multiple of 128 here

    q3 = q.reshape(BH, Lq, D)
    k3 = k.reshape(BH, Lk, D)
    v3 = v.reshape(BH, Lk, Dv)
    mask_f = jnp.broadcast_to(mask, (B, H, Lk)).astype(jnp.float32).reshape(BH, Lk)

    if Lqp != Lq:
        q3 = jnp.pad(q3, ((0, 0), (0, Lqp - Lq), (0, 0)))
    if Lkp != Lk:
        k3 = jnp.pad(k3, ((0, 0), (0, Lkp - Lk), (0, 0)))
        v3 = jnp.pad(v3, ((0, 0), (0, Lkp - Lk), (0, 0)))

    mk = mask_f
    if Lkp != Lk:
        mk = jnp.pad(mk, ((0, 0), (0, Lkp - Lk)))      # padded keys -> masked out
    mk = mk.reshape(BH, 1, Lkp)

    mq = mask_f
    if Lqp != Lq:
        mq = jnp.pad(mq, ((0, 0), (0, Lqp - Lq)))      # padded queries -> zero rows
    mq = mq.reshape(BH, Lqp, 1)

    grid = (BH, Lqp // bq, Lkp // bk)
    nq = Lqp // bq

    itemsize = jnp.dtype(q.dtype).itemsize
    cost = pl.CostEstimate(
        flops=int(2 * BH * Lqp * Lkp * (D + Dv)),
        transcendentals=int(BH * Lqp * Lkp),
        bytes_accessed=int((q3.size + BH * Lqp * Dv) * itemsize
                           + nq * (k3.size + v3.size) * itemsize
                           + (mk.size + mq.size) * 4),
    )

    # VMEM budget: double-buffered q/k/v/mask/out blocks + f32 scratch, with
    # headroom; clamp to 64 MiB (v7x physical VMEM).
    blk_bytes = (bq * D + bk * D + bk * Dv + bq * Dv) * itemsize + (bq + bk) * 128 * 4
    scratch_bytes = (bq * Dv + 2 * bq * 128) * 4
    vmem_limit = int(min(max(4 * (2 * blk_bytes + scratch_bytes), 16 << 20), 64 << 20))

    out = pl.pallas_call(
        functools.partial(_flash_sdpa_kernel,
                          inv_temperature=1.0 / float(temperature)),
        out_shape=jax.ShapeDtypeStruct((BH, Lqp, Dv), q.dtype),
        grid_spec=pltpu.PrefetchScalarGridSpec(
            num_scalar_prefetch=0,
            grid=grid,
            in_specs=[
                pl.BlockSpec((1, bq, D), lambda bh, qi, ki: (bh, qi, 0)),   # q tile
                pl.BlockSpec((1, bk, D), lambda bh, qi, ki: (bh, ki, 0)),   # K tile (streamed)
                pl.BlockSpec((1, bk, Dv), lambda bh, qi, ki: (bh, ki, 0)),  # V tile (streamed)
                pl.BlockSpec((1, 1, bk), lambda bh, qi, ki: (bh, 0, ki)),   # key mask row tile
                pl.BlockSpec((1, bq, 1), lambda bh, qi, ki: (bh, qi, 0)),   # query mask column
            ],
            out_specs=pl.BlockSpec((1, bq, Dv), lambda bh, qi, ki: (bh, qi, 0)),
            scratch_shapes=[
                pltpu.VMEM((bq, 1), jnp.float32),    # running max m
                pltpu.VMEM((bq, 1), jnp.float32),    # running denom l
                pltpu.VMEM((bq, Dv), jnp.float32),   # unnormalized accumulator
            ],
        ),
        compiler_params=pltpu.CompilerParams(
            dimension_semantics=("parallel", "parallel", "arbitrary"),
            vmem_limit_bytes=vmem_limit,
        ),
        cost_estimate=cost,
    )(q3, k3, v3, mk, mq)

    if Lqp != Lq:
        out = out[:, :Lq, :]
    return out.reshape(B, H, Lq, Dv)


def _reference(q, k, v, mask, temperature):
    attn = jnp.einsum("bhqd,bhkd->bhqk", q / temperature, k)
    attn = jnp.where(mask[:, :, None, :] == 0, -1e9, attn)
    attn = jax.nn.softmax(attn, axis=-1)
    out = jnp.einsum("bhqk,bhkd->bhqd", attn, v)
    out = jnp.where(mask[:, :, :, None] == 0, 0.0, out)
    return out


if __name__ == "__main__":
    # Small shapes consistent with the module: batch=2, heads=2, seq=16, d_k=32.
    B, H, L, D = 2, 2, 16, 32
    temperature = float(D) ** 0.5

    key = jax.random.PRNGKey(0)
    kq, kk, kv, km = jax.random.split(key, 4)

    q = jax.random.normal(kq, (B, H, L, D), dtype=jnp.float32)
    k = jax.random.normal(kk, (B, H, L, D), dtype=jnp.float32)
    v = jax.random.normal(kv, (B, H, L, D), dtype=jnp.float32)
    # binary keep/pad mask (nonzero = keep), same mask used for keys and queries
    mask = (jax.random.uniform(km, (B, H, L)) > 0.3).astype(jnp.float32)

    out = scaled_dot_product_attention(q, k, v, mask, temperature=temperature)
    out = jax.block_until_ready(out)

    ref = _reference(q, k, v, mask, temperature)
    assert out.shape == (B, H, L, D)
    # Slightly loose tolerance: approx (EUP) reciprocal + online-softmax reordering.
    err = jnp.max(jnp.abs(out - ref))
    assert jnp.allclose(out, ref, atol=2e-3, rtol=2e-3), f"max abs err {err}"

    print("KERNEL_OK")
</pallas_src>

<mosaic_0001>
module attributes {stable_mosaic.version = 11 : i64} {
  func.func @_flash_sdpa_kernel(%arg0: i32, %arg1: i32, %arg2: i32, %arg3: memref<1x16x32xf32, #tpu.memory_space<vmem>>, %arg4: memref<1x16x32xf32, #tpu.memory_space<vmem>>, %arg5: memref<1x16x32xf32, #tpu.memory_space<vmem>>, %arg6: memref<1x1x16xf32, #tpu.memory_space<vmem>>, %arg7: memref<1x16x1xf32, #tpu.memory_space<vmem>>, %arg8: memref<1x16x32xf32, #tpu.memory_space<vmem>>, %arg9: memref<16x1xf32, #tpu.memory_space<vmem>>, %arg10: memref<16x1xf32, #tpu.memory_space<vmem>>, %arg11: memref<16x32xf32, #tpu.memory_space<vmem>>) attributes {dimension_semantics = [#tpu.dimension_semantics<parallel>, #tpu.dimension_semantics<parallel>, #tpu.dimension_semantics<arbitrary>], iteration_bounds = array<i64: 4, 1, 1>, scalar_prefetch = 0 : i64, scratch_operands = 3 : i64, tpu.core_type = #tpu.core_type<tc>, window_params = [{transform_indices = @transform_0, window_bounds = array<i64: 1, 16, 32>}, {transform_indices = @transform_1, window_bounds = array<i64: 1, 16, 32>}, {transform_indices = @transform_2, window_bounds = array<i64: 1, 16, 32>}, {transform_indices = @transform_3, window_bounds = array<i64: 1, 1, 16>}, {transform_indices = @transform_4, window_bounds = array<i64: 1, 16, 1>}, {transform_indices = @transform_5, window_bounds = array<i64: 1, 16, 32>}]} {
    %c0_i32 = arith.constant 0 : i32
    %0 = arith.cmpi eq, %arg2, %c0_i32 : i32
    %1 = arith.extui %0 : i1 to i32
    %c0_i32_0 = arith.constant 0 : i32
    %2 = arith.cmpi ne, %1, %c0_i32_0 : i32
    scf.if %2 {
      %cst_32 = arith.constant 0xFF800000 : f32
      %45 = vector.broadcast %cst_32 : f32 to vector<16x1xf32>
      %c0_33 = arith.constant 0 : index
      %c0_34 = arith.constant 0 : index
      %46 = vector.load %arg9[%c0_33, %c0_34] : memref<16x1xf32, #tpu.memory_space<vmem>>, vector<16x1xf32>
      tpu.vector_store %arg9[%c0_33, %c0_34], %45 {strides = array<i32>} : memref<16x1xf32, #tpu.memory_space<vmem>>, vector<16x1xf32>,
      %cst_35 = arith.constant 0.000000e+00 : f32
      %47 = vector.broadcast %cst_35 : f32 to vector<16x1xf32>
      %c0_36 = arith.constant 0 : index
      %c0_37 = arith.constant 0 : index
      %48 = vector.load %arg10[%c0_36, %c0_37] : memref<16x1xf32, #tpu.memory_space<vmem>>, vector<16x1xf32>
      tpu.vector_store %arg10[%c0_36, %c0_37], %47 {strides = array<i32>} : memref<16x1xf32, #tpu.memory_space<vmem>>, vector<16x1xf32>,
      %cst_38 = arith.constant 0.000000e+00 : f32
      %49 = vector.broadcast %cst_38 : f32 to vector<16x32xf32>
      %c0_39 = arith.constant 0 : index
      %c0_40 = arith.constant 0 : index
      %50 = vector.load %arg11[%c0_39, %c0_40] : memref<16x32xf32, #tpu.memory_space<vmem>>, vector<16x32xf32>
      tpu.vector_store %arg11[%c0_39, %c0_40], %49 {strides = array<i32>} : memref<16x32xf32, #tpu.memory_space<vmem>>, vector<16x32xf32>,
    } else {
    }
    %c0 = arith.constant 0 : index
    %c0_1 = arith.constant 0 : index
    %c0_2 = arith.constant 0 : index
    %3 = vector.load %arg3[%c0, %c0_1, %c0_2] : memref<1x16x32xf32, #tpu.memory_space<vmem>>, vector<1x16x32xf32>
    %4 = vector.shape_cast %3 : vector<1x16x32xf32> to vector<16x32xf32>
    %cst = arith.constant 0.176776692 : f32
    %5 = vector.broadcast %cst : f32 to vector<16x32xf32>
    %6 = arith.mulf %4, %5 : vector<16x32xf32>
    %c0_3 = arith.constant 0 : index
    %c0_4 = arith.constant 0 : index
    %c0_5 = arith.constant 0 : index
    %7 = vector.load %arg4[%c0_3, %c0_4, %c0_5] : memref<1x16x32xf32, #tpu.memory_space<vmem>>, vector<1x16x32xf32>
    %8 = vector.shape_cast %7 : vector<1x16x32xf32> to vector<16x32xf32>
    %c0_6 = arith.constant 0 : index
    %c0_7 = arith.constant 0 : index
    %c0_8 = arith.constant 0 : index
    %9 = vector.load %arg5[%c0_6, %c0_7, %c0_8] : memref<1x16x32xf32, #tpu.memory_space<vmem>>, vector<1x16x32xf32>
    %10 = vector.shape_cast %9 : vector<1x16x32xf32> to vector<16x32xf32>
    %cst_9 = arith.constant dense<0.000000e+00> : vector<16x16xf32>
    %11 = tpu.matmul %6, %8, %cst_9 {dimension_numbers = #tpu.dot_dimension_numbers<[1], [1], [0], [0], [0, 0, 1, 0], [], []>} : vector<16x32xf32>, vector<16x32xf32>, vector<16x16xf32> -> vector<16x16xf32>
    %c0_10 = arith.constant 0 : index
    %c0_11 = arith.constant 0 : index
    %c0_12 = arith.constant 0 : index
    %12 = vector.load %arg6[%c0_10, %c0_11, %c0_12] : memref<1x1x16xf32, #tpu.memory_space<vmem>>, vector<1x1x16xf32>
    %13 = vector.shape_cast %12 : vector<1x1x16xf32> to vector<1x16xf32>
    %cst_13 = arith.constant 1.000000e+00 : f32
    %14 = vector.broadcast %cst_13 : f32 to vector<1x16xf32>
    %15 = arith.subf %13, %14 : vector<1x16xf32>
    %cst_14 = arith.constant 1.000000e+09 : f32
    %16 = vector.broadcast %cst_14 : f32 to vector<1x16xf32>
    %17 = arith.mulf %15, %16 : vector<1x16xf32>
    %18 = vector.broadcast %17 : vector<1x16xf32> to vector<16x16xf32>
    %19 = arith.addf %11, %18 : vector<16x16xf32>
    %c0_15 = arith.constant 0 : index
    %c0_16 = arith.constant 0 : index
    %20 = vector.load %arg9[%c0_15, %c0_16] : memref<16x1xf32, #tpu.memory_space<vmem>>, vector<16x1xf32>
    %cst_17 = arith.constant dense<0xFF800000> : vector<16xf32>
    %21 = vector.multi_reduction <maximumf>, %19, %cst_17 [1] : vector<16x16xf32> to vector<16xf32>
    %22 = vector.shape_cast %21 : vector<16xf32> to vector<16x1xf32>
    %23 = arith.maximumf %20, %22 : vector<16x1xf32>
    %24 = arith.subf %20, %23 : vector<16x1xf32>
    %25 = math.exp %24 : vector<16x1xf32>
    %26 = vector.broadcast %23 : vector<16x1xf32> to vector<16x16xf32>
    %27 = arith.subf %19, %26 : vector<16x16xf32>
    %28 = math.exp %27 : vector<16x16xf32>
    %c0_18 = arith.constant 0 : index
    %c0_19 = arith.constant 0 : index
    %29 = vector.load %arg10[%c0_18, %c0_19] : memref<16x1xf32, #tpu.memory_space<vmem>>, vector<16x1xf32>
    %30 = arith.mulf %25, %29 : vector<16x1xf32>
    %cst_20 = arith.constant dense<0.000000e+00> : vector<16xf32>
    %31 = vector.multi_reduction <add>, %28, %cst_20 [1] : vector<16x16xf32> to vector<16xf32>
    %32 = vector.shape_cast %31 : vector<16xf32> to vector<16x1xf32>
    %33 = arith.addf %30, %32 : vector<16x1xf32>
    %c0_21 = arith.constant 0 : index
    %c0_22 = arith.constant 0 : index
    %34 = vector.load %arg10[%c0_21, %c0_22] : memref<16x1xf32, #tpu.memory_space<vmem>>, vector<16x1xf32>
    tpu.vector_store %arg10[%c0_21, %c0_22], %33 {strides = array<i32>} : memref<16x1xf32, #tpu.memory_space<vmem>>, vector<16x1xf32>,
    %c0_23 = arith.constant 0 : index
    %c0_24 = arith.constant 0 : index
    %35 = vector.load %arg11[%c0_23, %c0_24] : memref<16x32xf32, #tpu.memory_space<vmem>>, vector<16x32xf32>
    %36 = vector.broadcast %25 : vector<16x1xf32> to vector<16x32xf32>
    %37 = arith.mulf %36, %35 : vector<16x32xf32>
    %cst_25 = arith.constant dense<0.000000e+00> : vector<16x32xf32>
    %38 = tpu.matmul %28, %10, %cst_25 {dimension_numbers = #tpu.dot_dimension_numbers<[1], [0], [0], [1], [0, 0, 1, 1], [], []>} : vector<16x16xf32>, vector<16x32xf32>, vector<16x32xf32> -> vector<16x32xf32>
    %39 = arith.addf %37, %38 : vector<16x32xf32>
    %c0_26 = arith.constant 0 : index
    %c0_27 = arith.constant 0 : index
    %40 = vector.load %arg11[%c0_26, %c0_27] : memref<16x32xf32, #tpu.memory_space<vmem>>, vector<16x32xf32>
    tpu.vector_store %arg11[%c0_26, %c0_27], %39 {strides = array<i32>} : memref<16x32xf32, #tpu.memory_space<vmem>>, vector<16x32xf32>,
    %c0_28 = arith.constant 0 : index
    %c0_29 = arith.constant 0 : index
    %41 = vector.load %arg9[%c0_28, %c0_29] : memref<16x1xf32, #tpu.memory_space<vmem>>, vector<16x1xf32>
    tpu.vector_store %arg9[%c0_28, %c0_29], %23 {strides = array<i32>} : memref<16x1xf32, #tpu.memory_space<vmem>>, vector<16x1xf32>,
    %c0_i32_30 = arith.constant 0 : i32
    %42 = arith.cmpi eq, %arg2, %c0_i32_30 : i32
    %43 = arith.extui %42 : i1 to i32
    %c0_i32_31 = arith.constant 0 : i32
    %44 = arith.cmpi ne, %43, %c0_i32_31 : i32
    scf.if %44 {
      %c0_32 = arith.constant 0 : index
      %c0_33 = arith.constant 0 : index
      %45 = vector.load %arg11[%c0_32, %c0_33] : memref<16x32xf32, #tpu.memory_space<vmem>>, vector<16x32xf32>
      %c0_34 = arith.constant 0 : index
      %c0_35 = arith.constant 0 : index
      %46 = vector.load %arg10[%c0_34, %c0_35] : memref<16x1xf32, #tpu.memory_space<vmem>>, vector<16x1xf32>
      %47 = tpu.reciprocal %46 {approx = true} : vector<16x1xf32> -> vector<16x1xf32>
      %48 = vector.broadcast %47 : vector<16x1xf32> to vector<16x32xf32>
      %49 = arith.mulf %45, %48 : vector<16x32xf32>
      %c0_36 = arith.constant 0 : index
      %c0_37 = arith.constant 0 : index
      %c0_38 = arith.constant 0 : index
      %50 = vector.load %arg7[%c0_36, %c0_37, %c0_38] : memref<1x16x1xf32, #tpu.memory_space<vmem>>, vector<1x16x1xf32>
      %51 = vector.shape_cast %50 : vector<1x16x1xf32> to vector<16x1xf32>
      %52 = vector.broadcast %51 : vector<16x1xf32> to vector<16x32xf32>
      %53 = arith.mulf %49, %52 : vector<16x32xf32>
      %c0_39 = arith.constant 0 : index
      %c0_40 = arith.constant 0 : index
      %c0_41 = arith.constant 0 : index
      %54 = vector.load %arg8[%c0_39, %c0_40, %c0_41] : memref<1x16x32xf32, #tpu.memory_space<vmem>>, vector<1x16x32xf32>
      %55 = vector.shape_cast %54 : vector<1x16x32xf32> to vector<16x32xf32>
      %56 = vector.shape_cast %53 : vector<16x32xf32> to vector<1x16x32xf32>
      tpu.vector_store %arg8[%c0_39, %c0_40, %c0_41], %56 {strides = array<i32>} : memref<1x16x32xf32, #tpu.memory_space<vmem>>, vector<1x16x32xf32>,
    } else {
    }
    return
  }
  func.func @transform_0(%arg0: i32, %arg1: i32, %arg2: i32) -> (i32, i32, i32) {
    %c0_i32 = arith.constant 0 : i32
    %c0_i32_0 = arith.constant 0 : i32
    return %arg0, %arg1, %c0_i32 : i32, i32, i32
  }
  func.func @transform_1(%arg0: i32, %arg1: i32, %arg2: i32) -> (i32, i32, i32) {
    %c0_i32 = arith.constant 0 : i32
    %c0_i32_0 = arith.constant 0 : i32
    return %arg0, %arg2, %c0_i32 : i32, i32, i32
  }
  func.func @transform_2(%arg0: i32, %arg1: i32, %arg2: i32) -> (i32, i32, i32) {
    %c0_i32 = arith.constant 0 : i32
    %c0_i32_0 = arith.constant 0 : i32
    return %arg0, %arg2, %c0_i32 : i32, i32, i32
  }
  func.func @transform_3(%arg0: i32, %arg1: i32, %arg2: i32) -> (i32, i32, i32) {
    %c0_i32 = arith.constant 0 : i32
    %c0_i32_0 = arith.constant 0 : i32
    return %arg0, %c0_i32, %arg2 : i32, i32, i32
  }
  func.func @transform_4(%arg0: i32, %arg1: i32, %arg2: i32) -> (i32, i32, i32) {
    %c0_i32 = arith.constant 0 : i32
    %c0_i32_0 = arith.constant 0 : i32
    return %arg0, %arg1, %c0_i32 : i32, i32, i32
  }
  func.func @transform_5(%arg0: i32, %arg1: i32, %arg2: i32) -> (i32, i32, i32) {
    %c0_i32 = arith.constant 0 : i32
    %c0_i32_0 = arith.constant 0 : i32
    return %arg0, %arg1, %c0_i32 : i32, i32, i32
  }
}

</mosaic_0001>

<bundles_post_ra>
// kernel: tpu_custom_call.1
= control target key start
LH: loop header
LB: loop body
LE: loop exit
PB: predicated region body
PF: predicated region fallthrough
CT: control target
= control target key end

     0   :  { %s1455_s0 = inlined_call_operand.vmem [shape: f32[4,16,32], index: 0, kind: input, shape index: {}]   ;;  %s1456_s1 = inlined_call_operand.hbm [shape: f32[4,16,32], index: 1, kind: input, shape index: {}]   ;;  %s1457_s2 = inlined_call_operand.hbm [shape: f32[4,16,32], index: 2, kind: input, shape index: {}]   ;;  %s1458_s3 = inlined_call_operand.vmem [shape: f32[4,1,16], index: 3, kind: input, shape index: {}]   ;;  %s1459_s4 = inlined_call_operand.vmem [shape: f32[4,16,1], index: 4, kind: input, shape index: {}]   ;;  %s1460_s5 = inlined_call_operand.hbm [shape: f32[4,16,32], index: 5, kind: output, shape index: {}]  }
   0x1   :  { %1462 = sst [smem:[#allocation16_spill]] %s1456_s1 }
   0x2   :  { %10 = vsyncpa [#allocation6], 0 }
   0x3   :  { %12 = vsyncpa [#allocation6 + $0x1], 0 }
   0x4   :  { %13 = vsyncpa [#allocation9], 0 }
   0x5   :  { %15 = vsyncpa [#allocation9 + $0x1], 0 }
   0x6   :  { %16 = vsyncpa [#allocation7], 0 }
   0x7   :  { %18 = vsyncpa [#allocation7 + $0x1], 0  ;;  %s1222_s18 = smov 0   ;;  %s1224_s19 = smov 0  }
   0x8   :  { %s1226_s20 = smov 0   ;;  %s1228_s21 = smov 0  }
   0x9   :  { %s1230_s22 = smov 0   ;;  %s1232_s23 = smov 0  }
   0xa LB: > { %s895_s24 = sadd.s32 4294967295, %s1180_s23   ;;  %s896_s25 = sadd.s32 4294967294, %s1180_s23   ;;  %s1180_s23 = sphi %s1232_s23, %s24_s23   ;;  %s1176_s22 = sphi %s1230_s22, %s1478_s22   ;;  %s1172_s21 = sphi %s1228_s21, %s1477_s21   ;;  %s1168_s20 = sphi %s1226_s20, %s1476_s20   ;;  %s1164_s19 = sphi %s1224_s19, %s1475_s19   ;;  %s1160_s18 = sphi %s1222_s18, %s1474_s18  }
   0xb   : > { %s43_s26 = sadd.s32 1, %s1176_s22  ;;  %s80_s27 = sadd.s32 1, %s1168_s20 }
   0xc   : > { %p45_p0 = scmp.ge.s32.totalorder %s43_s26, 4  ;;  %p87_p1 = scmp.ne.s32.totalorder %s1168_s20, %s1164_s19 }
   0xd   : > { %p88_p2 = scmp.eq.s32.totalorder %s1180_s23, 0  ;;  %p93_p3 = scmp.ne.s32.totalorder %s1164_s19, %s1160_s18 }
   0xe   : > { %s1480_s26 = smov (%p45_p0, %s43_s26), 0  ;;  %p94_p5 = scmp.eq.s32.totalorder %s895_s24, 0 }
   0xf   : > { %1463 = sst [smem:[#allocation14_spill]] %s1480_s26  ;;  %p1263_p4 = por %p88_p2, %p87_p1 }
  0x10   : > { %s75_s29 = ssub.s32 %s1176_s22, %s1480_s26  ;;  %p203_p6 = scmp.eq.s32.totalorder %s895_s24, 3 }
  0x11   : > { %p78_p7 = scmp.eq.s32.totalorder %s75_s29, 0  ;;  %p1269_p8 = por %p94_p5, %p93_p3 }
  0x12   : > { %p1273_p9 = por %p203_p6, %p87_p1  ;;  %p209_p10 = scmp.eq.s32.totalorder %s896_s25, 3 }
  0x13   : > { %s1278_s7 = scalar_select %p78_p7, %s1168_s20, %s80_s27  }
  0x14   : > { %p1280_p11 = por %p209_p10, %p93_p3  ;;  %p969_p12 = scmp.lt.s32.totalorder %s1180_s23, 4 }
  0x15   : > { %1467 = sst [smem:[#allocation15_spill]] %s1278_s7  ;;  %s1286_s9 = sand.u32 1, %s1168_s20  }
  0x16   : > { %s899_s10 = sshll.u32 %s1286_s9, 4  ;;  %s925_s11 = sshll.u32 %s1176_s22, 8 }
  0x17   : > { %s1469_s1 = sld [smem:[#allocation16_spill]]  ;;  %s246_s15 = scalar_lea.vmem [#allocation5], %s899_s10 }
  0x18   : > { %s255_s16 = sshll.u32 %s246_s15, 4  ;;  %p1299_p13 = pnand %p969_p12, %p1263_p4  ;;  %s256_s16 = int_to_ptr.vmem [resolvable:$true] %s255_s16 }
  0x19   : > { %p905_p0 = scmp.ge.s32.totalorder %s1180_s23, 1  ;;  %s243_s24 = scalar_lea.sflag [#allocation6], %s1286_s9 }
  0x1a   : > { %p1042_p1 = pneg %p1299_p13  ;;  %s1053_s25 = scalar_lea.vmem %s256_s16, 256 }
  0x1b   : > { %p1054_p2 = scmp.ne.s32.totalorder %s256_s16, %s1053_s25  ;;  %s1182_s27 = smov [#allocation5]  }
  0x1c   : > { %s1058_s29 = sshll.u32 %s1182_s27, 4  ;;  %s1059_s29 = int_to_ptr.vmem [resolvable:$false] %s1058_s29 }
  0x1d   : > { %s254_s14 = scalar_lea.hbm %s1469_s1, %s925_s11  ;;  %p1056_p3 = pnand %p1054_p2, %p1042_p1 }
  0x1e   : > { %s1060_s28 = scalar_lea.vmem %s1059_s29, 512  ;;  %p1061_p4 = scmp.lt.s32.totalorder %s256_s16, %s1059_s29 }
  0x1f   : > { %p1057_p5 = pneg %p1056_p3  ;;  %p1062_p6 = scmp.lt.s32.totalorder %s1060_s28, %s1053_s25 }
  0x21   : > { %p1063_p7 = por %p1062_p6, %p1061_p4 }
  0x23   : > { %p1064_p10 = pnand %p1063_p7, %p1057_p5 }
  0x25   : > { %1067 = shalt.err (!%p1064_p10)
}
  0x26   : > { %s1183_s12 = smov 128   ;;  %s1184_s13 = smov 8  }
  0x27   : > { %961 = dma.hbm_to_vmem [thread:$0]  (!%p1299_p13), %s254_s14, 256, %s256_s16, %s243_s24, %s1183_s12, %s1183_s12, %s1184_s13  }
  0x28   : > { %p308_p12 = scmp.lt.s32.totalorder %s1180_s23, 5  ;;  %s277_s25 = scalar_lea.hbm %s1457_s2, %s925_s11 }
  0x29   : > { %s269_s28 = scalar_lea.vmem [#allocation8], %s899_s10  ;;  %s266_s26 = scalar_lea.sflag [#allocation9], %s1286_s9 }
  0x2a   : > { %p1320_p2 = pnand %p905_p0, %p308_p12  ;;  %s278_s1 = sshll.u32 %s269_s28, 4  ;;  %s279_s1 = int_to_ptr.vmem [resolvable:$true] %s278_s1 }
  0x2b   : > { %s1081_s7 = scalar_lea.vmem %s279_s1, 256  ;;  %s1185_s14 = smov [#allocation8]  }
  0x2c   : > { %p1082_p3 = scmp.ne.s32.totalorder %s279_s1, %s1081_s7  ;;  %s1086_s16 = sshll.u32 %s1185_s14, 4  ;;  %s1087_s16 = int_to_ptr.vmem [resolvable:$false] %s1086_s16 }
  0x2d   : > { %s1088_s11 = scalar_lea.vmem %s1087_s16, 512  ;;  %p1089_p6 = scmp.lt.s32.totalorder %s279_s1, %s1087_s16 }
  0x2e   : > { %p1084_p5 = pnand %p1082_p3, %p1042_p1  ;;  %p1090_p0 = scmp.lt.s32.totalorder %s1088_s11, %s1081_s7 }
  0x30   : > { %p1085_p4 = pneg %p1084_p5  ;;  %p1091_p7 = por %p1090_p0, %p1089_p6 }
  0x32   : > { %p1092_p10 = pnand %p1091_p7, %p1085_p4 }
  0x34   : > { %1095 = shalt.err (!%p1092_p10)
}
  0x35   : > { %964 = dma.hbm_to_vmem [thread:$0]  (!%p1299_p13), %s277_s25, 256, %s279_s1, %s266_s26, %s1183_s12, %s1183_s12, %s1184_s13  }
  0x36   : > { %312 = sbr.rel (%p1320_p2) target bundleno = 867 (0x363), region = 40  ;;  %s1335_s9 = sand.u32 (!%p1320_p2), 1, %s1164_s19  }
  0x37   : > { %s1338_s10 = sshll.u32 (!%p1320_p2), %s1335_s9, 4  ;;  %s315_s24 = scalar_lea.sflag (!%p1320_p2), [#allocation6], %s1335_s9 }
  0x38   : > { %s318_s7 = scalar_lea.vmem (!%p1320_p2), [#allocation5], %s1338_s10 }
  0x3b   : > { %1147 = dma.done.wait (%p1269_p8), %s315_s24, 256  }
  0x3c   : > { %1149 = vsyncadd (%p1269_p8), %s315_s24, 4294967040  ;;  %s324_s1 = scalar_lea.sflag [#allocation9], %s1335_s9  ;;  %s327_s26 = scalar_lea.vmem [#allocation8], %s1338_s10 }
  0x3d   : > { %1151 = dma.done.wait (%p1269_p8), %s324_s1, 256  }
  0x3e   : > { %1153 = vsyncadd (%p1269_p8), %s324_s1, 4294967040  ;;  %p384_p13 = scmp.lt.s32.totalorder %s1172_s21, 3  ;;  %vm421_vm0 = vcmask 261120   ;;  %v429_v0 = vld [vmem:[%s318_s7 + $0x8] sm:$0xff]  ;;  %v428_v1 = vld [vmem:[%s318_s7] sm:$0xff]  ;;  %vm416_vm1 = vcmask 7168   ;;  %v436_v7 = vlaneseq }
  0x3f   : > { %938 = vmatprep.subr.msk.mxu0 %vm421_vm0, %v429_v0  ;;  %v1186_v6 = vmov -inf   ;;  %vm531_vm2 = vcmask 130048   ;;  %v1187_v20 = vmov 0   ;;  %v1188_v21 = vmov 0.0   ;;  %v431_v30 = vld [vmem:[%s327_s26 + $0x8] sm:$0xff]  ;;  %v430_v31 = vld [vmem:[%s327_s26] sm:$0xff] }
  0x40   : > { %s1354_s17 = scalar_select %p384_p13, %s1172_s21, 3  ;;  %939 = vmatpush3.xpose.msk.msra.mxu0 %vm421_vm0, %v429_v0  ;;  %417 = vst.msk [vmem:[#allocation2] sm:$0xff] %vm416_vm1, %v1186_v6  ;;  %418 = vst.msk [vmem:[#allocation2 + $0x8] sm:$0xff] %vm416_vm1, %v1186_v6  ;;  %v437_v10 = vshrl.u32 %v436_v7, 7  ;;  %1026 = vset.pattern.permute.xlu1 %v1187_v20 }
  0x41   : > { %940 = vmatprep.subr.msk.mxu0 %vm421_vm0, %v428_v1  ;;  %1027 = vset.pattern.permute.xlu0 %v1187_v20  ;;  %419 = vst.msk [vmem:[#allocation3] sm:$0xff] %vm416_vm1, %v1188_v21  ;;  %420 = vst.msk [vmem:[#allocation3 + $0x8] sm:$0xff] %vm416_vm1, %v1188_v21  ;;  %s929_s11 = sshll.u32 %s1172_s21, 8  ;;  %s382_s24 = scalar_lea.vmem [#allocation10], %s1338_s10 }
  0x42   : > { %s927_s12 = sshll.u32 %s1354_s17, 4  ;;  %s400_s29 = scalar_lea.vmem %s1458_s3, %s1354_s17  ;;  %v438_v12 = vsub.s32 0, %v437_v10  ;;  %422 = vst.msk [vmem:[#allocation4] sm:$0xff] %vm421_vm0, %v1188_v21  ;;  %423 = vst.msk [vmem:[#allocation4 + $0x8] sm:$0xff] %vm421_vm0, %v1188_v21  ;;  %945 = vmatprep.subr.mxu1 %v431_v30 }
  0x43   : > { %s391_s27 = scalar_lea.vmem %s1455_s0, %s927_s12  ;;  %v432_v8 = vld [vmem:[%s400_s29] sm:$0x1]  ;;  %946 = vmatpush3.msra.mxu1 %v431_v30  ;;  %s409_s16 = scalar_lea.vmem %s1459_s4, %s927_s12 }
  0x44   : > { %v424_v2 = vld [vmem:[%s391_s27] sm:$0xff]  ;;  %v425_v4 = vld [vmem:[%s391_s27 + $0x8] sm:$0xff]  ;;  %941 = vmatpush3.xpose.msk.msra.mxu0 %vm421_vm0, %v428_v1  ;;  %v913_v9 = vadd.f32 -1.0, %v432_v8  ;;  %947 = vmatprep.subr.mxu1 %v430_v31  ;;  %s731_s7 = sshll.u32 %s382_s24, 4  ;;  %s1404_s17 = scalar_lea.hbm %s1460_s5, %s929_s11  ;;  %s1406_s7 = int_to_ptr.vmem [resolvable:$true] %s731_s7 }
  0x45   : > { %v426_v3 = vmul.f32 0.17677669, %v424_v2  ;;  %v427_v5 = vmul.f32 0.17677669, %v425_v4  ;;  %948 = vmatpush3.msra.mxu1 %v430_v31  ;;  %v699_v46 = vld [vmem:[%s409_s16] sm:$0xff]  ;;  %v700_v59 = vld [vmem:[%s409_s16 + $0x8] sm:$0xff] }
  0x46   : > { %v434_v11 = vmul.f32 1e+09, %v913_v9  ;;  %s716_s21 = scalar_lea.sflag [#allocation7], %s1335_s9  ;;  %s1096_s10 = scalar_lea.vmem %s1406_s7, 256 }
  0x47   : > { %942 = vmatprep.mubr.msk.f32.mxu0 %vm421_vm0, %v426_v3  ;;  %v529_v22 = vld [vmem:[#allocation2] sm:$0xff]  ;;  %v530_v25 = vld [vmem:[#allocation2 + $0x8] sm:$0xff]  ;;  %p1097_p8 = scmp.ne.s32.totalorder %s1406_s7, %s1096_s10  ;;  %s1189_s12 = smov [#allocation10]  }
  0x48   : > { %943 = vmatmul.mubr.msk.f32.vlgmr.msra.gmra.mxu0 %vm421_vm0, %v427_v5  ;;  %v439_v14 = vrot.slane %v434_v11, %v438_v12  ;;  %v562_v47 = vld [vmem:[#allocation3] sm:$0xff]  ;;  %v563_v50 = vld [vmem:[#allocation3 + $0x8] sm:$0xff]  ;;  %s1100_s13 = sshll.u32 %s1189_s12, 4  ;;  %s1101_s13 = int_to_ptr.vmem [resolvable:$false] %s1100_s13 }
  0x49   : > { %v578_v60 = vld [vmem:[#allocation4 + $0x8] sm:$0xff]  ;;  %v577_v62 = vld [vmem:[#allocation4] sm:$0xff]  ;;  %p1098_p1 = pnand %p1097_p8, %p1273_p9  ;;  %s1102_s15 = scalar_lea.vmem %s1101_s13, 512 }
  0x4a   : > { %p1103_p2 = scmp.lt.s32.totalorder %s1406_s7, %s1101_s13  ;;  %p1104_p3 = scmp.lt.s32.totalorder %s1102_s15, %s1096_s10 }
  0x4b   : > { %p1099_p12 = pneg %p1098_p1 }
  0x4c   : > { %p1105_p5 = por %p1104_p3, %p1103_p2 }
  0x4e   : > { %p1106_p4 = pnand %p1105_p5, %p1099_p12 }
 0x108   : > { %v944_v13 = vpop.f32.mrf.mxu0 }
 0x109   : > { %v526_v17 = vadd.f32 %v944_v13, %v439_v14 }
 0x10a   : > { %v520_v15 = vpop.f32.mrf.mxu0 }
 0x10b   : > { %v521_v16 = vadd.f32 %v520_v15, %v439_v14  ;;  %v535_v19 = vsel %vm531_vm2, %v526_v17, -inf }
 0x10d   : > { %v532_v18 = vsel %vm531_vm2, %v521_v16, -inf }
 0x10e   : > { %533 = vmax.xlane.f32.xlu0 %v532_v18 }
 0x112   : > { %536 = vmax.xlane.f32.xlu0 %v535_v19 }
 0x197   : > { %v534_v23 = vpop.xlane.xlu0 %533 }
 0x198   : > { %v538_v24 = vmax.f32 %v529_v22, %v534_v23 }
 0x19a   : > { %v540_v26 = vsub.f32 %v529_v22, %v538_v24  ;;  %676 = vst.msk [vmem:[#allocation2] sm:$0xff] %vm416_vm1, %v538_v24  ;;  %548 = vperm.xlu1 %1026, %v538_v24  }
 0x19b   : > { %v537_v27 = vpop.xlane.xlu0 %536 }
 0x19c   : > { %v539_v28 = vmax.f32 %v530_v25, %v537_v27  ;;  %v542_v43 = vmul.f32 1.442695, %v540_v26 }
 0x19e   : > { %v541_v29 = vsub.f32 %v530_v25, %v539_v28  ;;  %677 = vst.msk [vmem:[#allocation2 + $0x8] sm:$0xff] %vm416_vm1, %v539_v28  ;;  %553 = vperm.xlu1 %1026, %v539_v28  }
 0x1a0   : > { %v544_v41 = vmul.f32 1.442695, %v541_v29 }
 0x215   : > { %v549_v32 = vpop.permute.xlu1 %548 }
 0x216   : > { %v556_v33 = vsub.f32 %v521_v16, %v549_v32 }
 0x218   : > { %v558_v34 = vmul.f32 1.442695, %v556_v33 }
 0x219   : > { %v554_v35 = vpop.permute.xlu1 %553 }
 0x21a   : > { %1028 = vpow2.f32 %v558_v34  ;;  %v557_v36 = vsub.f32 %v526_v17, %v554_v35 }
 0x21c   : > { %v560_v37 = vmul.f32 1.442695, %v557_v36 }
 0x21e   : > { %1030 = vpow2.f32 %v560_v37 }
 0x21f   : > { %1032 = vpow2.f32 %v544_v41 }
 0x220   : > { %1034 = vpow2.f32 %v542_v43 }
 0x227   : > { %v1029_v38 = vpop.eup %1028 }
 0x228   : > { %949 = vmatprep.mubr.msk.f32.mxu1 %vm531_vm2, %v1029_v38  ;;  %v566_v39 = vsel %vm531_vm2, %v1029_v38, 0.0 }
 0x229   : > { %567 = vadd.xlane.f32.xlu0 %v566_v39 }
 0x22b   : > { %v1031_v40 = vpop.eup %1030 }
 0x22c   : > { %950 = vmatmul.mubr.msk.f32.vlgmr.msra.gmra.mxu1 %vm531_vm2, %v1031_v40  ;;  %v569_v42 = vsel %vm531_vm2, %v1031_v40, 0.0  ;;  %v1033_v44 = vpop.eup %1032 }
 0x22d   : > { %570 = vadd.xlane.f32.xlu1 %v569_v42  ;;  %v1035_v45 = vpop.eup %1034  ;;  %v565_v52 = vmul.f32 %v1033_v44, %v563_v50 }
 0x22e   : > { %v564_v48 = vmul.f32 %v1035_v45, %v562_v47 }
 0x23e   : > { %586 = vperm.xlu1 %1026, %v1033_v44  }
 0x23f   : > { %581 = vperm.xlu0 %1027, %v1035_v45  }
 0x242   : > { %703 = vperm.xlu1 %1026, %v699_v46  }
 0x2b2   : > { %v568_v49 = vpop.xlane.xlu0 %567 }
 0x2b3   : > { %v572_v51 = vadd.f32 %v568_v49, %v564_v48 }
 0x2b5   : > { %575 = vst.msk [vmem:[#allocation3] sm:$0xff] %vm416_vm1, %v572_v51 }
 0x2b6   : > { %v571_v53 = vpop.xlane.xlu1 %570 }
 0x2b7   : > { %v573_v54 = vadd.f32 %v571_v53, %v565_v52 }
 0x2b9   : > { %576 = vst.msk [vmem:[#allocation3 + $0x8] sm:$0xff] %vm416_vm1, %v573_v54 }
 0x2ba   : > { %v587_v61 = vpop.permute.xlu1 %586  ;;  %v582_v63 = vpop.permute.xlu0 %581 }
 0x2bb   : > { %v590_v0 = vmul.f32 %v587_v61, %v578_v60  ;;  %v589_v2 = vmul.f32 %v582_v63, %v577_v62 }
 0x2bc   : > { %v683_v56 = vld [vmem:[#allocation3] sm:$0xff] }
 0x2be   : > { %v704_v10 = vpop.permute.xlu1 %703 }
 0x2c0   : > { %v684_v55 = vld [vmem:[#allocation3 + $0x8] sm:$0xff] }
 0x2c1   : > { %1036 = vrcp.f32 %v684_v55 }
 0x2c2   : > { %1038 = vrcp.f32 %v683_v56 }
 0x2ce   : > { %v1037_v57 = vpop.eup %1036 }
 0x2cf   : > { %694 = vperm.xlu0 %1027, %v1037_v57   ;;  %v1039_v58 = vpop.eup %1038 }
 0x2d3   : > { %689 = vperm.xlu0 %1027, %v1039_v58  }
 0x2d7   : > { %708 = vperm.xlu0 %1027, %v700_v59  }
 0x2ec   : > { %v951_v1 = vpop.f32.mrf.mxu1 }
 0x2ed   : > { %v673_v3 = vadd.f32 %v951_v1, %v590_v0 }
 0x2ee   : > { %v663_v4 = vpop.f32.mrf.mxu1 }
 0x2ef   : > { %675 = vst.msk [vmem:[#allocation4 + $0x8] sm:$0xff] %vm421_vm0, %v673_v3  ;;  %v672_v5 = vadd.f32 %v663_v4, %v589_v2 }
 0x2f1   : > { %674 = vst.msk [vmem:[#allocation4] sm:$0xff] %vm421_vm0, %v672_v5 }
 0x2f6   : > { %v682_v11 = vld [vmem:[#allocation4 + $0x8] sm:$0xff] }
 0x2f8   : > { %v681_v7 = vld [vmem:[#allocation4] sm:$0xff] }
 0x34a   : > { %v695_v6 = vpop.permute.xlu0 %694 }
 0x34b   : > { %v698_v12 = vmul.f32 %v695_v6, %v682_v11 }
 0x34e   : > { %v690_v8 = vpop.permute.xlu0 %689 }
 0x34f   : > { %v697_v9 = vmul.f32 %v690_v8, %v681_v7 }
 0x351   : > { %v711_v13 = vmul.f32 %v704_v10, %v697_v9 }
 0x352   : > { %v709_v14 = vpop.permute.xlu0 %708 }
 0x353   : > { %713 = vst.msk [vmem:[%s382_s24] sm:$0xff] %vm421_vm0, %v711_v13  ;;  %v712_v15 = vmul.f32 %v709_v14, %v698_v12 }
 0x355   : > { %714 = vst.msk [vmem:[%s382_s24 + $0x8] sm:$0xff] %vm421_vm0, %v712_v15 }
 0x356   : > { %1109 = shalt.err (!%p1106_p4)
}
 0x357   : > { %s1110_s27 = scalar_lea.hbm %s1404_s17, 256  ;;  %s1114_s29 = scalar_lea.hbm %s1460_s5, 1024 }
 0x358   : > { %p1111_p6 = scmp.ne.s32.totalorder %s1404_s17, %s1110_s27  ;;  %p1115_p10 = scmp.lt.s32.totalorder %s1404_s17, %s1460_s5 }
 0x359   : > { %p1116_p13 = scmp.lt.s32.totalorder %s1114_s29, %s1110_s27 }
 0x35a   : > { %p1112_p0 = pnand %p1111_p6, %p1273_p9 }
 0x35b   : > { %p1117_p8 = por %p1116_p13, %p1115_p10 }
 0x35c   : > { %p1113_p7 = pneg %p1112_p0 }
 0x35e   : > { %p1118_p1 = pnand %p1117_p8, %p1113_p7 }
 0x360   : > { %1121 = shalt.err (!%p1118_p1)
}
 0x361   : > { %s1190_s16 = smov 128   ;;  %s1191_s11 = smov 8  }
 0x362   : > { %956 = dma.vmem_to_hbm [thread:$0]  (%p1273_p9), %s1406_s7, 256, %s1404_s17, %s716_s21, %s1190_s16, %s1190_s16, %s1191_s11  }
 0x363 PF: > { %p970_p12 = scmp.ge.s32.totalorder %s1180_s23, 2  ;;  %s746_s24 = sand.u32 1, %s1160_s18  }
 0x364   : > { %s747_s1 = scalar_lea.sflag [#allocation7], %s746_s24 }
 0x365   : > { %p966_p2 = pnand %p970_p12, %p1280_p11 }
 0x367   : > { %p967_p3 = pneg %p966_p2 }
 0x369   : > { %1155 = dma.done.wait (%p967_p3), %s747_s1, 256  }
 0x36a   : > { %1157 = vsyncadd (%p967_p3), %s747_s1, 4294967040  ;;  %s24_s23 = sadd.s32 1, %s1180_s23   ;;  %s1472_s6 = sld [smem:[#allocation15_spill]] }
 0x36b   : > { %p21_p5 = scmp.ge.s32.totalorder %s24_s23, 6   ;;  %s1473_s9 = sld [smem:[#allocation14_spill]] }
 0x36c   : > { %s1474_s18 = smov %s1164_s19  ;;  %s1475_s19 = smov %s1168_s20 }
 0x36d   : > { %s1477_s21 = smov %s1176_s22  ;;  %23 = sbr.rel (!%p21_p5) target bundleno = 10 (0xa), region = 115 }
 0x370   : > { %s1476_s20 = smov %s1472_s6 }
 0x371   : > { %s1478_s22 = smov %s1473_s9 }
 0x372   :  { %752 = vsyncpa [#allocation6], 1 }
 0x373   :  { %754 = vsyncpa [#allocation6 + $0x1], 1 }
 0x374   :  { %755 = vsyncpa [#allocation9], 1 }
 0x375   :  { %757 = vsyncpa [#allocation9 + $0x1], 1 }
 0x376   :  { %758 = vsyncpa [#allocation7], 1 }
 0x377   :  { %760 = vsyncpa [#allocation7 + $0x1], 1 }

</bundles_post_ra>
